<compile_context>
chip_gen: v7x
topology: tpu7x:2x2x1
jax: 0.10.0
libtpu: 0.0.40
codegen_flags: <defaults>
</compile_context>

<pallas_src>
import jax
import jax.numpy as jnp
from jax.experimental import pallas as pl
from jax.experimental.pallas import tpu as pltpu

D = 10            # latent dim (d in the PyTorch module)
D2 = D * D        # 100
D2_PAD = 128      # d^2 padded to one full lane tile
DLAT_PAD = 32     # 2*d padded to a lane/sublane-friendly width


def _vae_kernel(x_ref,
                w1_ref, b1_ref,
                w2_ref, b2_ref,
                w3_ref, b3_ref,
                w4_ref, b4_ref,
                xhat_ref, mulv_ref):
    cdt = w1_ref.dtype                           # operand dtype (f32 or bf16)
    x = x_ref[...]                               # (TB, F), already in cdt

    # --- encoder ---
    h1 = jnp.dot(x, w1_ref[...], preferred_element_type=jnp.float32) + b1_ref[...]
    h1 = jnp.maximum(h1, 0.0).astype(cdt)        # ReLU; padded cols stay 0
    mu_lv = jnp.dot(h1, w2_ref[...], preferred_element_type=jnp.float32) + b2_ref[...]
    # mu_lv layout: [:, :D] = mu, [:, D:2D] = logvar, [:, 2D:] = 0 (zero-padded W2/b2)

    # --- decoder (eval-mode z = mu).  W3 has zero rows in the logvar / pad
    #     positions, so feeding the full mu_lv avoids an in-kernel lane slice. ---
    h2 = jnp.dot(mu_lv.astype(cdt), w3_ref[...],
                 preferred_element_type=jnp.float32) + b3_ref[...]
    h2 = jnp.maximum(h2, 0.0).astype(cdt)
    logits = jnp.dot(h2, w4_ref[...], preferred_element_type=jnp.float32) + b4_ref[...]

    xhat_ref[...] = jax.nn.sigmoid(logits)
    mulv_ref[...] = mu_lv                        # fused mu/logvar output


def _full_spec(arr):
    # Whole-array (2-D) block, constant index -> fetched once, resident for all steps.
    return pl.BlockSpec(arr.shape, lambda i: (0, 0))


def _round_up(x, m):
    return (x + m - 1) // m * m


def prepare_params(params, compute_dtype=jnp.float32):
    """Zero-pad raw PyTorch-layout params once on the host.

    W1:(F,100)->(F,128)  W2:(100,20)->(128,32)  W3:(10,100)->(32,128)
    W4:(100,F)->(128,F); biases padded to match.  Weights are cast to
    `compute_dtype` (bf16 halves their DMA traffic on v6e/v7x); biases stay f32
    so post-matmul adds / activations run in f32.
    """
    w1, b1, w2, b2, w3, b3, w4, b4 = params
    F = w1.shape[0]

    def pad_w(w, rows, cols):
        return jnp.pad(w, ((0, rows - w.shape[0]),
                           (0, cols - w.shape[1]))).astype(compute_dtype)

    def pad_b(b, cols):
        return jnp.pad(b, ((0, 0), (0, cols - b.shape[1]))).astype(jnp.float32)

    return (pad_w(w1, F, D2_PAD),        pad_b(b1, D2_PAD),
            pad_w(w2, D2_PAD, DLAT_PAD), pad_b(b2, DLAT_PAD),
            pad_w(w3, DLAT_PAD, D2_PAD), pad_b(b3, D2_PAD),
            pad_w(w4, D2_PAD, F),        pad_b(b4, F))


def vae_forward(x, prepared_params, *, tile_batch=512):
    """x: (..., num_features).  Returns (x_hat, mu, logvar) as (N, .) float32."""
    w1p, b1p, w2p, b2p, w3p, b3p, w4p, b4p = prepared_params
    compute_dtype = w1p.dtype
    F = w1p.shape[0]

    x = x.reshape(-1, F).astype(compute_dtype)   # torch's x.view(-1, num_features)
    N = x.shape[0]

    # Large tiles amortize the ~0.35us/step pipeline overhead, but keep >= 2
    # grid steps when the batch allows it (v7x: 2 TensorCores share the grid).
    half = max(8, _round_up((N + 1) // 2, 8))
    TB = max(8, (min(int(tile_batch), half) // 8) * 8)
    N_pad = _round_up(N, TB)
    if N_pad != N:
        x = jnp.pad(x, ((0, N_pad - N), (0, 0)))   # padded rows stripped below

    grid = (N_pad // TB,)

    in_specs = [pl.BlockSpec((TB, F), lambda i: (i, 0)),
                _full_spec(w1p), _full_spec(b1p),
                _full_spec(w2p), _full_spec(b2p),
                _full_spec(w3p), _full_spec(b3p),
                _full_spec(w4p), _full_spec(b4p)]
    out_specs = (pl.BlockSpec((TB, F), lambda i: (i, 0)),
                 pl.BlockSpec((TB, DLAT_PAD), lambda i: (i, 0)))
    out_shapes = (jax.ShapeDtypeStruct((N_pad, F), jnp.float32),       # x_hat
                  jax.ShapeDtypeStruct((N_pad, DLAT_PAD), jnp.float32))  # mu|logvar

    itemsize = jnp.dtype(compute_dtype).itemsize
    param_bytes = sum(int(p.size) * p.dtype.itemsize for p in prepared_params)
    cost = pl.CostEstimate(
        flops=2 * N_pad * (F * D2_PAD + D2_PAD * DLAT_PAD
                           + DLAT_PAD * D2_PAD + D2_PAD * F),
        transcendentals=N_pad * F,                         # sigmoid
        bytes_accessed=N_pad * F * itemsize                # x in
                       + N_pad * F * 4                     # x_hat out
                       + N_pad * DLAT_PAD * 4              # mu_lv out
                       + param_bytes)

    x_hat_p, mu_lv = pl.pallas_call(
        _vae_kernel,
        out_shape=out_shapes,
        grid_spec=pltpu.PrefetchScalarGridSpec(
            num_scalar_prefetch=0,
            grid=grid,
            in_specs=in_specs,
            out_specs=out_specs),
        compiler_params=pltpu.CompilerParams(
            dimension_semantics=("parallel",)),
        cost_estimate=cost,
    )(x, w1p, b1p, w2p, b2p, w3p, b3p, w4p, b4p)

    x_hat = x_hat_p[:N]
    mu = mu_lv[:N, :D]
    logvar = mu_lv[:N, D:2 * D]
    return x_hat, mu, logvar


def init_params(key, num_features):
    """Raw (unpadded) params; Linear(in,out) stored as W:(in,out), b:(1,out)."""
    dims = [(num_features, D2), (D2, 2 * D), (D, D2), (D2, num_features)]
    params = []
    for fan_in, fan_out in dims:
        key, kw, kb = jax.random.split(key, 3)
        bound = 1.0 / jnp.sqrt(fan_in)
        params.append(jax.random.uniform(kw, (fan_in, fan_out), jnp.float32,
                                         -bound, bound))
        params.append(jax.random.uniform(kb, (1, fan_out), jnp.float32,
                                         -bound, bound))
    return tuple(params)


def _reference(x, params):
    w1, b1, w2, b2, w3, b3, w4, b4 = params
    xf = x.reshape(-1, w1.shape[0])
    h1 = jnp.maximum(xf @ w1 + b1, 0.0)
    mu_lv = h1 @ w2 + b2
    mu, logvar = mu_lv[:, :D], mu_lv[:, D:]
    h2 = jnp.maximum(mu @ w3 + b3, 0.0)
    return jax.nn.sigmoid(h2 @ w4 + b4), mu, logvar


if __name__ == "__main__":
    num_features = 64

    key = jax.random.PRNGKey(0)
    key, kx = jax.random.split(key)
    # (5, 4, 64) -> flattened to N=20 rows inside the wrapper (mirrors x.view(-1, F)).
    x = jax.random.normal(kx, (5, 4, num_features), jnp.float32)
    raw_params = init_params(key, num_features)

    r_xhat, r_mu, r_logvar = _reference(x, raw_params)

    # --- f32 path (bit-for-bit comparable to the pure-JAX reference) ---
    prep_f32 = prepare_params(raw_params, compute_dtype=jnp.float32)
    x_hat, mu, logvar = vae_forward(x, prep_f32, tile_batch=512)
    jax.block_until_ready((x_hat, mu, logvar))
    assert jnp.allclose(x_hat, r_xhat, atol=1e-5, rtol=1e-5)
    assert jnp.allclose(mu, r_mu, atol=1e-5, rtol=1e-5)
    assert jnp.allclose(logvar, r_logvar, atol=1e-5, rtol=1e-5)

    # --- bf16 operand path (v6e/v7x HBM-traffic optimization), loose tolerance ---
    prep_bf16 = prepare_params(raw_params, compute_dtype=jnp.bfloat16)
    x_hat16, mu16, logvar16 = vae_forward(x, prep_bf16, tile_batch=512)
    jax.block_until_ready((x_hat16, mu16, logvar16))
    assert jnp.allclose(x_hat16, r_xhat, atol=5e-2, rtol=5e-2)
    assert jnp.allclose(mu16, r_mu, atol=5e-2, rtol=5e-2)
    assert jnp.allclose(logvar16, r_logvar, atol=5e-2, rtol=5e-2)

    print("KERNEL_OK")
</pallas_src>

<mosaic_0001>
module attributes {stable_mosaic.version = 11 : i64} {
  func.func @_vae_kernel(%arg0: i32, %arg1: memref<16x64xf32, #tpu.memory_space<vmem>>, %arg2: memref<64x128xf32, #tpu.memory_space<vmem>>, %arg3: memref<1x128xf32, #tpu.memory_space<vmem>>, %arg4: memref<128x32xf32, #tpu.memory_space<vmem>>, %arg5: memref<1x32xf32, #tpu.memory_space<vmem>>, %arg6: memref<32x128xf32, #tpu.memory_space<vmem>>, %arg7: memref<1x128xf32, #tpu.memory_space<vmem>>, %arg8: memref<128x64xf32, #tpu.memory_space<vmem>>, %arg9: memref<1x64xf32, #tpu.memory_space<vmem>>, %arg10: memref<16x64xf32, #tpu.memory_space<vmem>>, %arg11: memref<16x32xf32, #tpu.memory_space<vmem>>) attributes {dimension_semantics = [#tpu.dimension_semantics<parallel>], iteration_bounds = array<i64: 2>, scalar_prefetch = 0 : i64, scratch_operands = 0 : i64, tpu.core_type = #tpu.core_type<tc>, window_params = [{transform_indices = @transform_0, window_bounds = array<i64: 16, 64>}, {pipeline_mode = #tpu.pipeline_mode<synchronous>, transform_indices = @transform_1, window_bounds = array<i64: 64, 128>}, {pipeline_mode = #tpu.pipeline_mode<synchronous>, transform_indices = @transform_2, window_bounds = array<i64: 1, 128>}, {pipeline_mode = #tpu.pipeline_mode<synchronous>, transform_indices = @transform_3, window_bounds = array<i64: 128, 32>}, {pipeline_mode = #tpu.pipeline_mode<synchronous>, transform_indices = @transform_4, window_bounds = array<i64: 1, 32>}, {pipeline_mode = #tpu.pipeline_mode<synchronous>, transform_indices = @transform_5, window_bounds = array<i64: 32, 128>}, {pipeline_mode = #tpu.pipeline_mode<synchronous>, transform_indices = @transform_6, window_bounds = array<i64: 1, 128>}, {pipeline_mode = #tpu.pipeline_mode<synchronous>, transform_indices = @transform_7, window_bounds = array<i64: 128, 64>}, {pipeline_mode = #tpu.pipeline_mode<synchronous>, transform_indices = @transform_8, window_bounds = array<i64: 1, 64>}, {transform_indices = @transform_9, window_bounds = array<i64: 16, 64>}, {transform_indices = @transform_10, window_bounds = array<i64: 16, 32>}]} {
    %c0 = arith.constant 0 : index
    %c0_0 = arith.constant 0 : index
    %0 = vector.load %arg1[%c0, %c0_0] : memref<16x64xf32, #tpu.memory_space<vmem>>, vector<16x64xf32>
    %c0_1 = arith.constant 0 : index
    %c0_2 = arith.constant 0 : index
    %1 = vector.load %arg2[%c0_1, %c0_2] : memref<64x128xf32, #tpu.memory_space<vmem>>, vector<64x128xf32>
    %cst = arith.constant dense<0.000000e+00> : vector<16x128xf32>
    %2 = tpu.matmul %0, %1, %cst {dimension_numbers = #tpu.dot_dimension_numbers<[1], [0], [0], [1], [0, 0, 1, 1], [], []>} : vector<16x64xf32>, vector<64x128xf32>, vector<16x128xf32> -> vector<16x128xf32>
    %c0_3 = arith.constant 0 : index
    %c0_4 = arith.constant 0 : index
    %3 = vector.load %arg3[%c0_3, %c0_4] : memref<1x128xf32, #tpu.memory_space<vmem>>, vector<1x128xf32>
    %4 = vector.broadcast %3 : vector<1x128xf32> to vector<16x128xf32>
    %5 = arith.addf %2, %4 : vector<16x128xf32>
    %cst_5 = arith.constant 0.000000e+00 : f32
    %6 = vector.broadcast %cst_5 : f32 to vector<16x128xf32>
    %7 = arith.maximumf %5, %6 : vector<16x128xf32>
    %c0_6 = arith.constant 0 : index
    %c0_7 = arith.constant 0 : index
    %8 = vector.load %arg4[%c0_6, %c0_7] : memref<128x32xf32, #tpu.memory_space<vmem>>, vector<128x32xf32>
    %cst_8 = arith.constant dense<0.000000e+00> : vector<16x32xf32>
    %9 = tpu.matmul %7, %8, %cst_8 {dimension_numbers = #tpu.dot_dimension_numbers<[1], [0], [0], [1], [0, 0, 1, 1], [], []>} : vector<16x128xf32>, vector<128x32xf32>, vector<16x32xf32> -> vector<16x32xf32>
    %c0_9 = arith.constant 0 : index
    %c0_10 = arith.constant 0 : index
    %10 = vector.load %arg5[%c0_9, %c0_10] : memref<1x32xf32, #tpu.memory_space<vmem>>, vector<1x32xf32>
    %11 = vector.broadcast %10 : vector<1x32xf32> to vector<16x32xf32>
    %12 = arith.addf %9, %11 : vector<16x32xf32>
    %c0_11 = arith.constant 0 : index
    %c0_12 = arith.constant 0 : index
    %13 = vector.load %arg6[%c0_11, %c0_12] : memref<32x128xf32, #tpu.memory_space<vmem>>, vector<32x128xf32>
    %cst_13 = arith.constant dense<0.000000e+00> : vector<16x128xf32>
    %14 = tpu.matmul %12, %13, %cst_13 {dimension_numbers = #tpu.dot_dimension_numbers<[1], [0], [0], [1], [0, 0, 1, 1], [], []>} : vector<16x32xf32>, vector<32x128xf32>, vector<16x128xf32> -> vector<16x128xf32>
    %c0_14 = arith.constant 0 : index
    %c0_15 = arith.constant 0 : index
    %15 = vector.load %arg7[%c0_14, %c0_15] : memref<1x128xf32, #tpu.memory_space<vmem>>, vector<1x128xf32>
    %16 = vector.broadcast %15 : vector<1x128xf32> to vector<16x128xf32>
    %17 = arith.addf %14, %16 : vector<16x128xf32>
    %cst_16 = arith.constant 0.000000e+00 : f32
    %18 = vector.broadcast %cst_16 : f32 to vector<16x128xf32>
    %19 = arith.maximumf %17, %18 : vector<16x128xf32>
    %c0_17 = arith.constant 0 : index
    %c0_18 = arith.constant 0 : index
    %20 = vector.load %arg8[%c0_17, %c0_18] : memref<128x64xf32, #tpu.memory_space<vmem>>, vector<128x64xf32>
    %cst_19 = arith.constant dense<0.000000e+00> : vector<16x64xf32>
    %21 = tpu.matmul %19, %20, %cst_19 {dimension_numbers = #tpu.dot_dimension_numbers<[1], [0], [0], [1], [0, 0, 1, 1], [], []>} : vector<16x128xf32>, vector<128x64xf32>, vector<16x64xf32> -> vector<16x64xf32>
    %c0_20 = arith.constant 0 : index
    %c0_21 = arith.constant 0 : index
    %22 = vector.load %arg9[%c0_20, %c0_21] : memref<1x64xf32, #tpu.memory_space<vmem>>, vector<1x64xf32>
    %23 = vector.broadcast %22 : vector<1x64xf32> to vector<16x64xf32>
    %24 = arith.addf %21, %23 : vector<16x64xf32>
    %25 = arith.negf %24 : vector<16x64xf32>
    %26 = math.exp %25 : vector<16x64xf32>
    %cst_22 = arith.constant 1.000000e+00 : f32
    %27 = vector.broadcast %cst_22 : f32 to vector<16x64xf32>
    %28 = arith.addf %27, %26 : vector<16x64xf32>
    %29 = arith.divf %27, %28 : vector<16x64xf32>
    %c0_23 = arith.constant 0 : index
    %c0_24 = arith.constant 0 : index
    %30 = vector.load %arg10[%c0_23, %c0_24] : memref<16x64xf32, #tpu.memory_space<vmem>>, vector<16x64xf32>
    tpu.vector_store %arg10[%c0_23, %c0_24], %29 {strides = array<i32>} : memref<16x64xf32, #tpu.memory_space<vmem>>, vector<16x64xf32>,
    %c0_25 = arith.constant 0 : index
    %c0_26 = arith.constant 0 : index
    %31 = vector.load %arg11[%c0_25, %c0_26] : memref<16x32xf32, #tpu.memory_space<vmem>>, vector<16x32xf32>
    tpu.vector_store %arg11[%c0_25, %c0_26], %12 {strides = array<i32>} : memref<16x32xf32, #tpu.memory_space<vmem>>, vector<16x32xf32>,
    return
  }
  func.func @transform_0(%arg0: i32) -> (i32, i32) {
    %c0_i32 = arith.constant 0 : i32
    %c0_i32_0 = arith.constant 0 : i32
    return %arg0, %c0_i32 : i32, i32
  }
  func.func @transform_1(%arg0: i32) -> (i32, i32) {
    %c0_i32 = arith.constant 0 : i32
    %c0_i32_0 = arith.constant 0 : i32
    %c0_i32_1 = arith.constant 0 : i32
    return %c0_i32, %c0_i32_0 : i32, i32
  }
  func.func @transform_2(%arg0: i32) -> (i32, i32) {
    %c0_i32 = arith.constant 0 : i32
    %c0_i32_0 = arith.constant 0 : i32
    %c0_i32_1 = arith.constant 0 : i32
    return %c0_i32, %c0_i32_0 : i32, i32
  }
  func.func @transform_3(%arg0: i32) -> (i32, i32) {
    %c0_i32 = arith.constant 0 : i32
    %c0_i32_0 = arith.constant 0 : i32
    %c0_i32_1 = arith.constant 0 : i32
    return %c0_i32, %c0_i32_0 : i32, i32
  }
  func.func @transform_4(%arg0: i32) -> (i32, i32) {
    %c0_i32 = arith.constant 0 : i32
    %c0_i32_0 = arith.constant 0 : i32
    %c0_i32_1 = arith.constant 0 : i32
    return %c0_i32, %c0_i32_0 : i32, i32
  }
  func.func @transform_5(%arg0: i32) -> (i32, i32) {
    %c0_i32 = arith.constant 0 : i32
    %c0_i32_0 = arith.constant 0 : i32
    %c0_i32_1 = arith.constant 0 : i32
    return %c0_i32, %c0_i32_0 : i32, i32
  }
  func.func @transform_6(%arg0: i32) -> (i32, i32) {
    %c0_i32 = arith.constant 0 : i32
    %c0_i32_0 = arith.constant 0 : i32
    %c0_i32_1 = arith.constant 0 : i32
    return %c0_i32, %c0_i32_0 : i32, i32
  }
  func.func @transform_7(%arg0: i32) -> (i32, i32) {
    %c0_i32 = arith.constant 0 : i32
    %c0_i32_0 = arith.constant 0 : i32
    %c0_i32_1 = arith.constant 0 : i32
    return %c0_i32, %c0_i32_0 : i32, i32
  }
  func.func @transform_8(%arg0: i32) -> (i32, i32) {
    %c0_i32 = arith.constant 0 : i32
    %c0_i32_0 = arith.constant 0 : i32
    %c0_i32_1 = arith.constant 0 : i32
    return %c0_i32, %c0_i32_0 : i32, i32
  }
  func.func @transform_9(%arg0: i32) -> (i32, i32) {
    %c0_i32 = arith.constant 0 : i32
    %c0_i32_0 = arith.constant 0 : i32
    return %arg0, %c0_i32 : i32, i32
  }
  func.func @transform_10(%arg0: i32) -> (i32, i32) {
    %c0_i32 = arith.constant 0 : i32
    %c0_i32_0 = arith.constant 0 : i32
    return %arg0, %c0_i32 : i32, i32
  }
}

</mosaic_0001>

<bundles_post_ra>
// kernel: tpu_custom_call.1
= control target key start
LH: loop header
LB: loop body
LE: loop exit
PB: predicated region body
PF: predicated region fallthrough
CT: control target
= control target key end

     0   :  { %s1690_s0 = inlined_call_operand.vmem [shape: f32[32,64], index: 0, kind: input, shape index: {}]   ;;  %s1691_s1 = inlined_call_operand.vmem [shape: f32[64,128], index: 1, kind: input, shape index: {}]   ;;  %s1692_s2 = inlined_call_operand.vmem [shape: f32[1,128], index: 2, kind: input, shape index: {}]   ;;  %s1693_s3 = inlined_call_operand.vmem [shape: f32[128,32], index: 3, kind: input, shape index: {}]   ;;  %s1694_s4 = inlined_call_operand.vmem [shape: f32[1,32], index: 4, kind: input, shape index: {}]   ;;  %s1695_s5 = inlined_call_operand.vmem [shape: f32[32,128], index: 5, kind: input, shape index: {}]   ;;  %s1696_s6 = inlined_call_operand.vmem [shape: f32[1,128], index: 6, kind: input, shape index: {}]   ;;  %s1697_s7 = inlined_call_operand.vmem [shape: f32[128,64], index: 7, kind: input, shape index: {}]   ;;  %s1698_s8 = inlined_call_operand.vmem [shape: f32[1,64], index: 8, kind: input, shape index: {}]   ;;  %s1699_s9 = inlined_call_operand.hbm [shape: f32[32,64], index: 9, kind: output, shape index: {0}]   ;;  %s1700_s10 = inlined_call_operand.hbm [shape: f32[32,32], index: 10, kind: output, shape index: {1}]  }
   0x1   :  { %1703 = sst [smem:[#allocation8_spill]] %s1690_s0 }
   0x2   :  { %16 = vsyncpa [#allocation3], 0 }
   0x3   :  { %18 = vsyncpa [#allocation3 + $0x1], 0 }
   0x4   :  { %19 = vsyncpa [#allocation5], 0 }
   0x5   :  { %21 = vsyncpa [#allocation5 + $0x1], 0  ;;  %s1387_s13 = smov 0   ;;  %s1389_s14 = smov 0  }
   0x6   :  { %s1391_s15 = smov 0   ;;  %s1393_s16 = smov 0  }
   0x7 LB: > { %s1408_s17 = sadd.s32 4294967295, %s1326_s16   ;;  %s910_s18 = sadd.s32 4294967294, %s1326_s16   ;;  %s1326_s16 = sphi %s1393_s16, %s1713_s16   ;;  %s1322_s15 = sphi %s1391_s15, %s1712_s15   ;;  %s1318_s14 = sphi %s1389_s14, %s1711_s14   ;;  %s1314_s13 = sphi %s1387_s13, %s1710_s13  }
   0x8   : > { %s1412_s19 = sadd.s32 1, %s1326_s16   ;;  %s228_s20 = sadd.s32 1, %s1322_s15 }
   0x9   : > { %s225_s21 = ssub.s32 %s1326_s16, %s1412_s19  ;;  %p238_p0 = scmp.ne.s32.totalorder %s1322_s15, %s1318_s14 }
   0xa   : > { %p226_p1 = scmp.eq.s32.totalorder %s225_s21, 0  ;;  %p239_p2 = scmp.eq.s32.totalorder %s1408_s17, 1 }
   0xb   : > { %p244_p3 = scmp.ne.s32.totalorder %s1318_s14, %s1314_s13  ;;  %p245_p4 = scmp.eq.s32.totalorder %s910_s18, 1 }
   0xc   : > { %s1423_s22 = scalar_select %p226_p1, %s1322_s15, %s228_s20  }
   0xd   : > { %p1425_p5 = por %p239_p2, %p238_p0  ;;  %p1429_p6 = por %p245_p4, %p244_p3 }
   0xe   : > { %p913_p7 = scmp.ge.s32.totalorder %s1326_s16, 1  ;;  %p322_p8 = scmp.lt.s32.totalorder %s1326_s16, 3 }
  0x10   : > { %p323_p9 = pnand %p913_p7, %p322_p8 }
  0x11   : > { %v375_v0 = vld [vmem:[%s1691_s1] sm:$0xff] (!%p323_p9)  ;;  %v376_v1 = vld [vmem:[%s1691_s1 + $0x8] sm:$0xff] (!%p323_p9)  ;;  %v377_v2 = vld [vmem:[%s1691_s1 + $0x10] sm:$0xff] (!%p323_p9)  ;;  %s916_s11 = sshll.u32 (!%p323_p9), %s1408_s17, 1  ;;  %vm390_vm0 = vcmask (!%p323_p9), 523264   ;;  %s1706_s0 = sld [smem:[#allocation8_spill]] (!%p323_p9) }
  0x12   : > { %326 = sbr.rel (%p323_p9) target bundleno = 944 (0x3b0), region = 56  ;;  %v1090_v3 = vpack.c.bf16 (!%p323_p9), %v376_v1, %v375_v0  ;;  %v378_v4 = vld [vmem:[%s1691_s1 + $0x18] sm:$0xff] (!%p323_p9)  ;;  %p366_p10 = scmp.lt.s32.totalorder (!%p323_p9), %s916_s11, 3  ;;  %v379_v6 = vld [vmem:[%s1691_s1 + $0x20] sm:$0xff] (!%p323_p9)  ;;  %v380_v7 = vld [vmem:[%s1691_s1 + $0x28] sm:$0xff] (!%p323_p9)  ;;  %vm583_vm1 = vcmask (!%p323_p9), 261120  }
  0x13   : > { %v1094_v5 = vpack.c.bf16 (!%p323_p9), %v378_v4, %v377_v2  ;;  %v1098_v8 = vpack.c.bf16 (!%p323_p9), %v380_v7, %v379_v6  ;;  %v381_v9 = vld [vmem:[%s1691_s1 + $0x30] sm:$0xff] (!%p323_p9)  ;;  %v382_v10 = vld [vmem:[%s1691_s1 + $0x38] sm:$0xff] (!%p323_p9)  ;;  %v474_v13 = vld [vmem:[%s1693_s3] sm:$0xff] (!%p323_p9)  ;;  %s1535_s28 = sand.u32 (!%p323_p9), 1, %s1318_s14   ;;  %s1702_s29 = sshll.u32 (!%p323_p9), %s1408_s17, 8 }
  0x14   : > { %1091 = vmatprep.subr.bf16.mxu1 (!%p323_p9), %v1090_v3  ;;  %v1102_v12 = vpack.c.bf16 (!%p323_p9), %v382_v10, %v381_v9  ;;  %v475_v14 = vld [vmem:[%s1693_s3 + $0x8] sm:$0xff] (!%p323_p9)  ;;  %v476_v16 = vld [vmem:[%s1693_s3 + $0x10] sm:$0xff] (!%p323_p9)  ;;  %v477_v17 = vld [vmem:[%s1693_s3 + $0x18] sm:$0xff] (!%p323_p9)  ;;  %s1598_s12 = scalar_lea.hbm (!%p323_p9), %s1700_s10, %s1702_s29  ;;  %s787_s20 = scalar_lea.sflag (!%p323_p9), [#allocation5], %s1535_s28 }
  0x15   : > { %1093 = vmatpush3.bf16.msra.mxu1 (!%p323_p9), %v1090_v3  ;;  %v1106_v15 = vpack.c.bf16 (!%p323_p9), %v475_v14, %v474_v13  ;;  %v1110_v19 = vpack.c.bf16 (!%p323_p9), %v477_v17, %v476_v16  ;;  %v478_v20 = vld [vmem:[%s1693_s3 + $0x20] sm:$0xff] (!%p323_p9)  ;;  %v479_v21 = vld [vmem:[%s1693_s3 + $0x28] sm:$0xff] (!%p323_p9)  ;;  %v480_v23 = vld [vmem:[%s1693_s3 + $0x30] sm:$0xff] (!%p323_p9)  ;;  %s1328_s26 = smov (!%p323_p9), [#allocation4]  }
  0x16   : > { %1095 = vmatprep.subr.bf16.mxu1 (!%p323_p9), %v1094_v5  ;;  %v1114_v22 = vpack.c.bf16 (!%p323_p9), %v479_v21, %v478_v20  ;;  %v481_v24 = vld [vmem:[%s1693_s3 + $0x38] sm:$0xff] (!%p323_p9)  ;;  %v482_v26 = vld [vmem:[%s1693_s3 + $0x40] sm:$0xff] (!%p323_p9)  ;;  %v483_v27 = vld [vmem:[%s1693_s3 + $0x48] sm:$0xff] (!%p323_p9) }
  0x17   : > { %v1118_v25 = vpack.c.bf16 (!%p323_p9), %v481_v24, %v480_v23  ;;  %v1122_v28 = vpack.c.bf16 (!%p323_p9), %v483_v27, %v482_v26  ;;  %v484_v29 = vld [vmem:[%s1693_s3 + $0x50] sm:$0xff] (!%p323_p9)  ;;  %v485_v30 = vld [vmem:[%s1693_s3 + $0x58] sm:$0xff] (!%p323_p9)  ;;  %v486_v32 = vld [vmem:[%s1693_s3 + $0x60] sm:$0xff] (!%p323_p9) }
  0x18   : > { %v1126_v31 = vpack.c.bf16 (!%p323_p9), %v485_v30, %v484_v29  ;;  %v487_v33 = vld [vmem:[%s1693_s3 + $0x68] sm:$0xff] (!%p323_p9)  ;;  %v488_v35 = vld [vmem:[%s1693_s3 + $0x70] sm:$0xff] (!%p323_p9)  ;;  %v489_v36 = vld [vmem:[%s1693_s3 + $0x78] sm:$0xff] (!%p323_p9) }
  0x19   : > { %s1715_s11 = smov (!%p366_p10, %s916_s11), 3  ;;  %1097 = vmatpush3.bf16.msra.mxu1 %v1094_v5  ;;  %v1130_v34 = vpack.c.bf16 %v487_v33, %v486_v32  ;;  %v1134_v37 = vpack.c.bf16 %v489_v36, %v488_v35  ;;  %v572_v38 = vld [vmem:[%s1695_s5] sm:$0xff]  ;;  %v573_v39 = vld [vmem:[%s1695_s5 + $0x8] sm:$0xff]  ;;  %v574_v48 = vld [vmem:[%s1695_s5 + $0x10] sm:$0xff] }
  0x1a   : > { %s917_s27 = sshll.u32 %s1715_s11, 3  ;;  %1099 = vmatprep.subr.bf16.mxu1 %v1098_v8  ;;  %v1138_v40 = vpack.c.bf16 %v573_v39, %v572_v38  ;;  %v918_v41 = vld [vmem:[%s1692_s2] ss:$0 sm:$0xff]  ;;  %v575_v49 = vld [vmem:[%s1695_s5 + $0x18] sm:$0xff]  ;;  %v668_v52 = vld [vmem:[%s1697_s7 + $0x8] sm:$0xff] }
  0x1b   : > { %s369_s21 = scalar_lea.vmem %s1706_s0, %s917_s27  ;;  %v1142_v50 = vpack.c.bf16 %v575_v49, %v574_v48  ;;  %v667_v51 = vld [vmem:[%s1697_s7] sm:$0xff]  ;;  %v669_v56 = vld [vmem:[%s1697_s7 + $0x10] sm:$0xff]  ;;  %v670_v57 = vld [vmem:[%s1697_s7 + $0x18] sm:$0xff] }
  0x1c   : > { %v373_v11 = vld [vmem:[%s369_s21] sm:$0xff]  ;;  %v374_v18 = vld [vmem:[%s369_s21 + $0x8] sm:$0xff]  ;;  %1139 = vmatprep.subr.bf16.mxu0 %v1138_v40  ;;  %v1146_v53 = vpack.c.bf16 %v668_v52, %v667_v51  ;;  %s1701_s21 = sshll.u32 %s1535_s28, 4  ;;  %v1150_v61 = vpack.c.bf16 %v670_v57, %v669_v56  ;;  %v673_v1 = vld [vmem:[%s1697_s7 + $0x30] sm:$0xff] }
  0x1d   : > { %1006 = vmatprep.mubr.msk.f32.mxu1 %vm390_vm0, %v373_v11  ;;  %1101 = vmatpush3.bf16.msra.mxu1 %v1098_v8  ;;  %v921_v54 = vld [vmem:[%s1694_s4] ss:$0 sm:$0xff]  ;;  %s1549_s11 = scalar_lea.vmem [#allocation4], %s1701_s21  ;;  %v672_v63 = vld [vmem:[%s1697_s7 + $0x28] sm:$0xff]  ;;  %v674_v2 = vld [vmem:[%s1697_s7 + $0x38] sm:$0xff]  ;;  %s1236_s21 = sshll.u32 %s1328_s26, 4  ;;  %s1237_s21 = int_to_ptr.vmem [resolvable:$false] %s1236_s21 }
  0x1e   : > { %1103 = vmatprep.subr.bf16.mxu1 %v1102_v12  ;;  %1141 = vmatpush3.bf16.msra.mxu0 %v1138_v40  ;;  %v671_v62 = vld [vmem:[%s1697_s7 + $0x20] sm:$0xff]  ;;  %v1158_v3 = vpack.c.bf16 %v674_v2, %v673_v1  ;;  %v676_v5 = vld [vmem:[%s1697_s7 + $0x48] sm:$0xff]  ;;  %v677_v7 = vld [vmem:[%s1697_s7 + $0x50] sm:$0xff]  ;;  %s816_s18 = sshll.u32 %s1549_s11, 4  ;;  %s1238_s0 = scalar_lea.vmem %s1237_s21, 512  ;;  %s1601_s18 = int_to_ptr.vmem [resolvable:$true] %s816_s18 }
  0x1f   : > { %1143 = vmatprep.subr.bf16.mxu0 %v1142_v50  ;;  %v1154_v0 = vpack.c.bf16 %v672_v63, %v671_v62  ;;  %v675_v4 = vld [vmem:[%s1697_s7 + $0x40] sm:$0xff]  ;;  %v678_v8 = vld [vmem:[%s1697_s7 + $0x58] sm:$0xff]  ;;  %v680_v11 = vld [vmem:[%s1697_s7 + $0x68] sm:$0xff]  ;;  %s1232_s25 = scalar_lea.vmem %s1601_s18, 256  ;;  %p1239_p0 = scmp.lt.s32.totalorder %s1601_s18, %s1237_s21 }
  0x20   : > { %v1162_v6 = vpack.c.bf16 %v676_v5, %v675_v4  ;;  %v1166_v9 = vpack.c.bf16 %v678_v8, %v677_v7  ;;  %v679_v10 = vld [vmem:[%s1697_s7 + $0x60] sm:$0xff]  ;;  %v681_v13 = vld [vmem:[%s1697_s7 + $0x70] sm:$0xff]  ;;  %v682_v14 = vld [vmem:[%s1697_s7 + $0x78] sm:$0xff]  ;;  %p1233_p11 = scmp.ne.s32.totalorder %s1601_s18, %s1232_s25  ;;  %p1240_p1 = scmp.lt.s32.totalorder %s1238_s0, %s1232_s25 }
  0x21   : > { %1105 = vmatpush3.bf16.msra.mxu1 %v1102_v12  ;;  %v1170_v12 = vpack.c.bf16 %v680_v11, %v679_v10  ;;  %v922_v16 = vld [vmem:[%s1696_s6] ss:$0 sm:$0xff] }
  0x22   : > { %1107 = vmatprep.subr.bf16.mxu1 %v1106_v15  ;;  %1145 = vmatpush3.bf16.msra.mxu0 %v1142_v50  ;;  %p1234_p12 = pnand %p1233_p11, %p1425_p5  ;;  %p1241_p2 = por %p1240_p1, %p1239_p0 }
  0x23   : > { %1147 = vmatprep.subr.bf16.mxu0 %v1146_v53 }
  0x24   : > { %1007 = vmatmul.mubr.msk.f32.vlgmr.msra.gmra.mrb[0].mxu1 %vm390_vm0, %v374_v18  ;;  %p1235_p13 = pneg %p1234_p12 }
  0x25   : > { %1109 = vmatpush3.bf16.msra.mxu1 %v1106_v15  ;;  %v1174_v15 = vpack.c.bf16 %v682_v14, %v681_v13 }
  0x26   : > { %1111 = vmatprep.subr.bf16.mxu1 %v1110_v19  ;;  %p1242_p3 = pnand %p1241_p2, %p1235_p13 }
  0x29   : > { %1113 = vmatpush3.bf16.msra.mxu1 %v1110_v19 }
  0x2a   : > { %1115 = vmatprep.subr.bf16.mxu1 %v1114_v22 }
  0x2d   : > { %1117 = vmatpush3.bf16.msra.mxu1 %v1114_v22 }
  0x2e   : > { %1119 = vmatprep.subr.bf16.mxu1 %v1118_v25 }
  0x31   : > { %1121 = vmatpush3.bf16.msra.mxu1 %v1118_v25 }
  0x32   : > { %1123 = vmatprep.subr.bf16.mxu1 %v1122_v28 }
  0x35   : > { %1125 = vmatpush3.bf16.msra.mxu1 %v1122_v28 }
  0x36   : > { %1127 = vmatprep.subr.bf16.mxu1 %v1126_v31 }
  0x39   : > { %1129 = vmatpush3.bf16.msra.mxu1 %v1126_v31 }
  0x3a   : > { %1131 = vmatprep.subr.bf16.mxu1 %v1130_v34 }
  0x3d   : > { %1133 = vmatpush3.bf16.msra.mxu1 %v1130_v34 }
  0x3e   : > { %1135 = vmatprep.subr.bf16.mxu1 %v1134_v37 }
  0x41   : > { %1137 = vmatpush3.bf16.msra.mxu1 %v1134_v37 }
  0xf7   : > { %v1008_v42 = vpop.f32.mrb[0].mxu1 }
  0xf8   : > { %v469_v43 = vadd.f32 %v1008_v42, %v918_v41  ;;  %v463_v44 = vpop.f32.mrb[1].mxu1 }
  0xf9   : > { %v464_v45 = vadd.f32 %v918_v41, %v463_v44 }
  0xfa   : > { %v473_v47 = vmax.f32 %v469_v43, 0.0 }
  0xfb   : > { %v472_v46 = vmax.f32 %v464_v45, 0.0 }
  0xfd   : > { %1041 = vmatprep.mubr.f32.mxu1 %v472_v46 }
  0xfe   : > { %1042 = vmatmul.mubr.f32.vlgmr.msra.gmra.mrb[2].mxu1 %v473_v47 }
 0x1d1   : > { %v1043_v55 = vpop.f32.mrb[2].mxu1 }
 0x1d2   : > { %v569_v58 = vadd.f32 %v1043_v55, %v921_v54  ;;  %v563_v59 = vpop.f32.mrb[3].mxu1 }
 0x1d3   : > { %v564_v60 = vadd.f32 %v921_v54, %v563_v59 }
 0x1d4   : > { %780 = vst.msk [vmem:[%s1549_s11 + $0x8] sm:$0xff] %vm583_vm1, %v569_v58 }
 0x1d5   : > { %1052 = vmatprep.mubr.msk.f32.mxu0 %vm583_vm1, %v564_v60  ;;  %779 = vst.msk [vmem:[%s1549_s11] sm:$0xff] %vm583_vm1, %v564_v60 }
 0x1d6   : > { %1053 = vmatmul.mubr.msk.f32.vlgmr.msra.gmra.mrb[0].mxu0 %vm583_vm1, %v569_v58 }
 0x1d7   : > { %1149 = vmatpush3.bf16.msra.mxu0 %v1146_v53 }
 0x1d8   : > { %1151 = vmatprep.subr.bf16.mxu0 %v1150_v61 }
 0x1db   : > { %1153 = vmatpush3.bf16.msra.mxu0 %v1150_v61 }
 0x1dc   : > { %1155 = vmatprep.subr.bf16.mxu0 %v1154_v0 }
 0x1df   : > { %1157 = vmatpush3.bf16.msra.mxu0 %v1154_v0 }
 0x1e0   : > { %1159 = vmatprep.subr.bf16.mxu0 %v1158_v3 }
 0x1e3   : > { %1161 = vmatpush3.bf16.msra.mxu0 %v1158_v3 }
 0x1e4   : > { %1163 = vmatprep.subr.bf16.mxu0 %v1162_v6 }
 0x1e7   : > { %1165 = vmatpush3.bf16.msra.mxu0 %v1162_v6 }
 0x1e8   : > { %1167 = vmatprep.subr.bf16.mxu0 %v1166_v9 }
 0x1eb   : > { %1169 = vmatpush3.bf16.msra.mxu0 %v1166_v9 }
 0x1ec   : > { %1171 = vmatprep.subr.bf16.mxu0 %v1170_v12 }
 0x1ef   : > { %1173 = vmatpush3.bf16.msra.mxu0 %v1170_v12 }
 0x1f0   : > { %1175 = vmatprep.subr.bf16.mxu0 %v1174_v15 }
 0x1f3   : > { %1177 = vmatpush3.bf16.msra.mxu0 %v1174_v15 }
 0x2a9   : > { %v1054_v17 = vpop.f32.mrb[0].mxu0 }
 0x2aa   : > { %v662_v18 = vadd.f32 %v1054_v17, %v922_v16  ;;  %v656_v19 = vpop.f32.mrb[1].mxu0 }
 0x2ab   : > { %v657_v20 = vadd.f32 %v922_v16, %v656_v19 }
 0x2ac   : > { %v666_v22 = vmax.f32 %v662_v18, 0.0 }
 0x2ad   : > { %v665_v21 = vmax.f32 %v657_v20, 0.0 }
 0x2af   : > { %1087 = vmatprep.mubr.f32.mxu0 %v665_v21 }
 0x2b0   : > { %1088 = vmatmul.mubr.f32.vlgmr.msra.gmra.mrb[2].mxu0 %v666_v22 }
 0x2b1   : > { %1245 = shalt.err (!%p1242_p3)
}
 0x2b2   : > { %s1246_s11 = scalar_lea.hbm %s1598_s12, 256  ;;  %s1250_s26 = scalar_lea.hbm %s1700_s10, 512 }
 0x2b3   : > { %p1247_p4 = scmp.ne.s32.totalorder %s1598_s12, %s1246_s11  ;;  %p1251_p9 = scmp.lt.u32.totalorder %s1598_s12, %s1700_s10 }
 0x2b4   : > { %p1252_p10 = scmp.lt.u32.totalorder %s1250_s26, %s1246_s11  ;;  %p1254_p12 = scmp.lt.u32.totalorder %s1246_s11, %s1598_s12 }
 0x2b5   : > { %p1248_p7 = pnand %p1247_p4, %p1425_p5 }
 0x2b6   : > { %p1253_p11 = por %p1252_p10, %p1251_p9 }
 0x2b7   : > { %p1249_p8 = pneg %p1248_p7 }
 0x2b8   : > { %p1255_p13 = por %p1254_p12, %p1253_p11 }
 0x2ba   : > { %p1256_p0 = pnand %p1255_p13, %p1249_p8 }
 0x2bc   : > { %1259 = shalt.err (!%p1256_p0)
}
 0x2bd   : > { %s1329_s0 = smov 128   ;;  %s1330_s25 = smov 8   ;;  %v925_v23 = vld [vmem:[%s1698_s8] ss:$0 sm:$0xff] }
 0x2be   : > { %1179 = dma.vmem_to_hbm [thread:$0]  (%p1425_p5), %s1601_s18, 256, %s1598_s12, %s787_s20, %s1329_s0, %s1329_s0, %s1330_s25  }
 0x2bf   : > { %s1707_s12 = sshll.u32 %s1535_s28, 4  ;;  %s1708_s11 = sshll.u32 %s1408_s17, 8 }
 0x2c0   : > { %s357_s18 = scalar_lea.vmem [#allocation2], %s1707_s12  ;;  %s1640_s21 = scalar_lea.hbm %s1699_s9, %s1708_s11 }
 0x2c1   : > { %s800_s20 = sshll.u32 %s357_s18, 4  ;;  %s1331_s17 = smov [#allocation2]   ;;  %s1642_s20 = int_to_ptr.vmem [resolvable:$true] %s800_s20 }
 0x2c2   : > { %s1260_s30 = scalar_lea.vmem %s1642_s20, 256  ;;  %s1264_s12 = sshll.u32 %s1331_s17, 4  ;;  %s1265_s12 = int_to_ptr.vmem [resolvable:$false] %s1264_s12 }
 0x2c3   : > { %p1261_p1 = scmp.ne.s32.totalorder %s1642_s20, %s1260_s30  ;;  %s1266_s11 = scalar_lea.vmem %s1265_s12, 512 }
 0x2c4   : > { %p1267_p4 = scmp.lt.s32.totalorder %s1642_s20, %s1265_s12  ;;  %p1268_p7 = scmp.lt.s32.totalorder %s1266_s11, %s1260_s30 }
 0x2c5   : > { %p1262_p2 = pnand %p1261_p1, %p1425_p5 }
 0x2c6   : > { %p1269_p8 = por %p1268_p7, %p1267_p4 }
 0x2c7   : > { %p1263_p3 = pneg %p1262_p2 }
 0x2c9   : > { %p1270_p9 = pnand %p1269_p8, %p1263_p3 }
 0x383   : > { %v1089_v24 = vpop.f32.mrb[2].mxu0 }
 0x384   : > { %v762_v25 = vadd.f32 %v1089_v24, %v925_v23  ;;  %v756_v26 = vpop.f32.mrb[3].mxu0 }
 0x385   : > { %v757_v27 = vadd.f32 %v925_v23, %v756_v26 }
 0x386   : > { %v927_v28 = vmul.f32 -1.442695, %v762_v25 }
 0x387   : > { %v926_v29 = vmul.f32 -1.442695, %v757_v27 }
 0x388   : > { %1224 = vpow2.f32 %v927_v28 }
 0x389   : > { %1226 = vpow2.f32 %v926_v29 }
 0x392   : > { %v1225_v30 = vpop.eup %1224 }
 0x393   : > { %v1227_v31 = vpop.eup %1226  ;;  %v772_v32 = vadd.f32 1.0, %v1225_v30 }
 0x394   : > { %v771_v33 = vadd.f32 1.0, %v1227_v31 }
 0x395   : > { %1228 = vrcp.f32 %v772_v32 }
 0x396   : > { %1230 = vrcp.f32 %v771_v33 }
 0x39f   : > { %v1229_v34 = vpop.eup %1228 }
 0x3a0   : > { %v1231_v35 = vpop.eup %1230  ;;  %778 = vst.msk [vmem:[%s357_s18 + $0x8] sm:$0xff] %vm390_vm0, %v1229_v34 }
 0x3a1   : > { %777 = vst.msk [vmem:[%s357_s18] sm:$0xff] %vm390_vm0, %v1231_v35 }
 0x3a2   : > { %1273 = shalt.err (!%p1270_p9)
}
 0x3a3   : > { %s1274_s18 = scalar_lea.hbm %s1640_s21, 256  ;;  %s1278_s17 = scalar_lea.hbm %s1699_s9, 512 }
 0x3a4   : > { %p1275_p10 = scmp.ne.s32.totalorder %s1640_s21, %s1274_s18  ;;  %p1279_p13 = scmp.lt.u32.totalorder %s1640_s21, %s1699_s9 }
 0x3a5   : > { %p1280_p0 = scmp.lt.u32.totalorder %s1278_s17, %s1274_s18  ;;  %p1282_p2 = scmp.lt.u32.totalorder %s1274_s18, %s1640_s21 }
 0x3a6   : > { %p1276_p11 = pnand %p1275_p10, %p1425_p5 }
 0x3a7   : > { %p1281_p1 = por %p1280_p0, %p1279_p13 }
 0x3a8   : > { %p1277_p12 = pneg %p1276_p11 }
 0x3a9   : > { %p1283_p3 = por %p1282_p2, %p1281_p1 }
 0x3ab   : > { %p1284_p4 = pnand %p1283_p3, %p1277_p12 }
 0x3ad   : > { %1287 = shalt.err (!%p1284_p4)
}
 0x3ae   : > { %s1709_s30 = scalar_lea.sflag [#allocation3], %s1535_s28 }
 0x3af   : > { %1178 = dma.vmem_to_hbm [thread:$0]  (%p1425_p5), %s1642_s20, 256, %s1640_s21, %s1709_s30, %s1329_s0, %s1329_s0, %s1330_s25  }
 0x3b0 PF: > { %p1189_p7 = scmp.ge.s32.totalorder %s1326_s16, 2  ;;  %s831_s29 = sand.u32 1, %s1314_s13  }
 0x3b1   : > { %s832_s11 = scalar_lea.sflag [#allocation3], %s831_s29 }
 0x3b2   : > { %p1183_p8 = pnand %p1189_p7, %p1429_p6 }
 0x3b4   : > { %1305 = dma.done.wait (!%p1183_p8), %s832_s11, 256  }
 0x3b5   : > { %1307 = vsyncadd (!%p1183_p8), %s832_s11, 4294967040  ;;  %s841_s23 = scalar_lea.sflag [#allocation5], %s831_s29 }
 0x3b6   : > { %1309 = dma.done.wait (!%p1183_p8), %s841_s23, 256  }
 0x3b7   : > { %1311 = vsyncadd (!%p1183_p8), %s841_s23, 4294967040  ;;  %p24_p5 = scmp.ge.s32.totalorder %s1412_s19, 4   ;;  %s1710_s13 = smov %s1318_s14 }
 0x3b8   : > { %s1711_s14 = smov %s1322_s15  ;;  %s1712_s15 = smov %s1423_s22 }
 0x3b9   : > { %s1713_s16 = smov %s1412_s19  ;;  %26 = sbr.rel (!%p24_p5) target bundleno = 7 (0x7), region = 108 }
 0x3c0   :  { %846 = vsyncpa [#allocation3], 1 }
 0x3c1   :  { %848 = vsyncpa [#allocation3 + $0x1], 1 }
 0x3c2   :  { %849 = vsyncpa [#allocation5], 1 }
 0x3c3   :  { %851 = vsyncpa [#allocation5 + $0x1], 1 }

</bundles_post_ra>
